<compile_context>
chip_gen: v5e
topology: v5e:2x2
jax: 0.10.0
libtpu: 0.0.40
codegen_flags: <defaults>
</compile_context>

<pallas_src>
import math
import functools

import jax
import jax.numpy as jnp
from jax import lax
from jax.experimental import pallas as pl
from jax.experimental.pallas import tpu as pltpu


def _round_up(a, b):
    return ((a + b - 1) // b) * b


def _make_net_kernel(chunk):
    def net_kernel(x_ref, w1b1_ref, w2_ref, scale_ref, o_ref):
        # x_ref:    (2, TN)   batch on lanes, input features on sublanes
        # w1b1_ref: (H, 3)    cols = [W1[:,0], W1[:,1], b1]
        # w2_ref:   (1, H)
        # scale_ref:(1, 1)    = -exp(b2)
        # o_ref:    (1, TN)
        w1a = w1b1_ref[:, 0:1]            # (H, 1)   static slices: free
        w1b = w1b1_ref[:, 1:2]            # (H, 1)
        b1 = w1b1_ref[:, 2:3]             # (H, 1)
        w2 = w2_ref[...]                  # (1, H)
        # Hoist the scale broadcast out of the chunk loop (JAX does not CSE it).
        scale_b = jnp.broadcast_to(scale_ref[...], (1, chunk))

        n_chunks = o_ref.shape[1] // chunk

        def body(c, carry):
            off = pl.multiple_of(c * chunk, 128)
            x0 = x_ref[0:1, pl.ds(off, chunk)]        # (1, chunk)
            x1 = x_ref[1:2, pl.ds(off, chunk)]        # (1, chunk)
            # Layer 1: two broadcast FMAs (VPU) + tanh (EUP) -> (H, chunk) in vregs
            h = jnp.tanh(w1a * x0 + w1b * x1 + b1)
            # Layer 2: lane-dense (1, H) @ (H, chunk) on the MXU -> (1, chunk)
            y = jnp.dot(w2, h, preferred_element_type=jnp.float32)
            o_ref[:, pl.ds(off, chunk)] = (scale_b * jnp.exp(y)).astype(o_ref.dtype)
            return carry

        lax.fori_loop(0, n_chunks, body, 0, unroll=True)

    return net_kernel


def net_forward(x, w1, b1, w2, b2, *, tn=16384, chunk=512):
    """x: (N, 2) float32.  PyTorch-layout params.  Returns (N, 1) float32."""
    N, fin = x.shape
    H = w1.shape[0]

    # ---- tile geometry -------------------------------------------------
    n128 = _round_up(N, 128)
    chunk = max(128, (chunk // 128) * 128)
    chunk = min(chunk, n128)                                   # multiple of 128
    tn_eff = max(chunk, (min(tn, n128) // chunk) * chunk)      # multiple of chunk
    # Keep at least 2 grid steps when the batch allows it (v7x has 2 TCs).
    if n128 >= 2 * chunk:
        half = max(chunk, (n128 // (2 * chunk)) * chunk)
        tn_eff = min(tn_eff, half)
    Np = _round_up(N, tn_eff)

    # ---- operand prep ---------------------------------------------------
    # Transposed, zero-padded input: (2, Np), batch on lanes.
    # TODO(synk): if the upstream producer can emit x already as (2, N), drop
    # this separate transpose/pad pass (it is an extra HBM round trip).
    xt = jnp.zeros((fin, Np), x.dtype).at[:, :N].set(x.T)

    w1b1 = jnp.concatenate([w1, b1.reshape(H, 1)], axis=1)     # (H, 3)
    w2r = w2.reshape(1, H)                                     # (1, H)
    scale = (-jnp.exp(b2)).reshape(1, 1)                       # (1, 1)

    kernel = _make_net_kernel(chunk)

    out_t = pl.pallas_call(
        kernel,
        out_shape=jax.ShapeDtypeStruct((1, Np), jnp.float32),
        grid_spec=pltpu.PrefetchScalarGridSpec(
            num_scalar_prefetch=0,
            grid=(Np // tn_eff,),
            in_specs=[
                pl.BlockSpec((fin, tn_eff), lambda i: (0, i)),  # x^T tile
                pl.BlockSpec((H, 3), lambda i: (0, 0)),         # [W1 | b1]
                pl.BlockSpec((1, H), lambda i: (0, 0)),         # W2
                pl.BlockSpec((1, 1), lambda i: (0, 0)),         # -exp(b2)
            ],
            out_specs=pl.BlockSpec((1, tn_eff), lambda i: (0, i)),
        ),
        compiler_params=pltpu.CompilerParams(
            dimension_semantics=("parallel",),  # shard grid steps across TCs (v7x)
        ),
    )(xt, w1b1, w2r, scale)

    return out_t[0, :N].reshape(N, 1)


def init_params(key, n_hidden):
    """Deterministic params matching nn.Linear shapes + xavier_normal_ weights."""
    k1, k2, k3, k4 = jax.random.split(key, 4)
    # hidden: Linear(2, H); weight (H, 2); xavier normal std = sqrt(2/(fan_in+fan_out))
    std1 = math.sqrt(2.0 / (2 + n_hidden))
    w1 = jax.random.normal(k1, (n_hidden, 2), jnp.float32) * std1
    # PyTorch Linear bias init: U(-1/sqrt(fan_in), 1/sqrt(fan_in))
    b1 = jax.random.uniform(
        k2, (n_hidden,), jnp.float32, -1.0 / math.sqrt(2), 1.0 / math.sqrt(2)
    )
    # predict: Linear(H, 1); weight (1, H)
    std2 = math.sqrt(2.0 / (n_hidden + 1))
    w2 = jax.random.normal(k3, (1, n_hidden), jnp.float32) * std2
    b2 = jax.random.uniform(
        k4, (1,), jnp.float32, -1.0 / math.sqrt(n_hidden), 1.0 / math.sqrt(n_hidden)
    )
    return w1, b1, w2, b2


def reference_forward(x, w1, b1, w2, b2):
    h = jnp.tanh(x @ w1.T + b1)
    return -jnp.exp(h @ w2.T + b2)


if __name__ == "__main__":
    key = jax.random.PRNGKey(0)
    kx, kp, kx2, kx3 = jax.random.split(key, 4)

    H = 32
    w1, b1, w2, b2 = init_params(kp, H)

    fwd = jax.jit(functools.partial(net_forward, tn=16384, chunk=512))

    # Small batch (exercises padding 8 -> 128 lanes, single chunk, single step).
    N = 8
    x = jax.random.normal(kx, (N, 2), jnp.float32)
    out = jax.block_until_ready(fwd(x, w1, b1, w2, b2))
    ref = reference_forward(x, w1, b1, w2, b2)
    assert out.shape == (N, 1)
    assert jnp.allclose(out, ref, atol=1e-5, rtol=1e-5), "mismatch vs reference (N=8)"

    # Ragged batch not divisible by 128 (exercises pad + slice path).
    N2 = 200
    x2 = jax.random.normal(kx2, (N2, 2), jnp.float32)
    out2 = jax.block_until_ready(fwd(x2, w1, b1, w2, b2))
    ref2 = reference_forward(x2, w1, b1, w2, b2)
    assert out2.shape == (N2, 1)
    assert jnp.allclose(out2, ref2, atol=1e-5, rtol=1e-5), "mismatch vs reference (N=200)"

    # Larger batch: multiple grid steps (>=2 for v7x) and multiple inner chunks.
    N3 = 4096
    x3 = jax.random.normal(kx3, (N3, 2), jnp.float32)
    out3 = jax.block_until_ready(fwd(x3, w1, b1, w2, b2))
    ref3 = reference_forward(x3, w1, b1, w2, b2)
    assert out3.shape == (N3, 1)
    assert jnp.allclose(out3, ref3, atol=1e-5, rtol=1e-5), "mismatch vs reference (N=4096)"

    print("KERNEL_OK")
</pallas_src>

<mosaic_0001>
module attributes {stable_mosaic.version = 11 : i64} {
  func.func @net_kernel(%arg0: i32, %arg1: memref<2x128xf32, #tpu.memory_space<vmem>>, %arg2: memref<32x3xf32, #tpu.memory_space<vmem>>, %arg3: memref<1x32xf32, #tpu.memory_space<vmem>>, %arg4: memref<1x1xf32, #tpu.memory_space<vmem>>, %arg5: memref<1x128xf32, #tpu.memory_space<vmem>>) attributes {dimension_semantics = [#tpu.dimension_semantics<parallel>], iteration_bounds = array<i64: 1>, scalar_prefetch = 0 : i64, scratch_operands = 0 : i64, tpu.core_type = #tpu.core_type<tc>, window_params = [{transform_indices = @transform_0, window_bounds = array<i64: 2, 128>}, {pipeline_mode = #tpu.pipeline_mode<synchronous>, transform_indices = @transform_1, window_bounds = array<i64: 32, 3>}, {pipeline_mode = #tpu.pipeline_mode<synchronous>, transform_indices = @transform_2, window_bounds = array<i64: 1, 32>}, {pipeline_mode = #tpu.pipeline_mode<synchronous>, transform_indices = @transform_3, window_bounds = array<i64: 1, 1>}, {transform_indices = @transform_4, window_bounds = array<i64: 1, 128>}]} {
    %c0 = arith.constant 0 : index
    %c0_0 = arith.constant 0 : index
    %0 = vector.load %arg2[%c0, %c0_0] : memref<32x3xf32, #tpu.memory_space<vmem>>, vector<32x1xf32>
    %c0_1 = arith.constant 0 : index
    %c1 = arith.constant 1 : index
    %1 = vector.load %arg2[%c0_1, %c1] : memref<32x3xf32, #tpu.memory_space<vmem>>, vector<32x1xf32>
    %c0_2 = arith.constant 0 : index
    %c2 = arith.constant 2 : index
    %2 = vector.load %arg2[%c0_2, %c2] : memref<32x3xf32, #tpu.memory_space<vmem>>, vector<32x1xf32>
    %c0_3 = arith.constant 0 : index
    %c0_4 = arith.constant 0 : index
    %3 = vector.load %arg3[%c0_3, %c0_4] : memref<1x32xf32, #tpu.memory_space<vmem>>, vector<1x32xf32>
    %c0_5 = arith.constant 0 : index
    %c0_6 = arith.constant 0 : index
    %4 = vector.load %arg4[%c0_5, %c0_6] : memref<1x1xf32, #tpu.memory_space<vmem>>, vector<1x1xf32>
    %5 = vector.shape_cast %4 : vector<1x1xf32> to vector<1x1xf32>
    %6 = vector.broadcast %5 : vector<1x1xf32> to vector<1x128xf32>
    %c0_i32 = arith.constant 0 : i32
    %c128_i32 = arith.constant 128 : i32
    %7 = arith.muli %c0_i32, %c128_i32 : i32
    %8 = tpu.assume_multiple %7, 128 : i32
    %c0_7 = arith.constant 0 : index
    %9 = arith.index_cast %8 : i32 to index
    %10 = vector.load %arg1[%c0_7, %9] : memref<2x128xf32, #tpu.memory_space<vmem>>, vector<1x128xf32>
    %c1_8 = arith.constant 1 : index
    %11 = arith.index_cast %8 : i32 to index
    %12 = vector.load %arg1[%c1_8, %11] : memref<2x128xf32, #tpu.memory_space<vmem>>, vector<1x128xf32>
    %13 = vector.broadcast %0 : vector<32x1xf32> to vector<32x128xf32>
    %14 = vector.broadcast %10 : vector<1x128xf32> to vector<32x128xf32>
    %15 = arith.mulf %13, %14 : vector<32x128xf32>
    %16 = vector.broadcast %1 : vector<32x1xf32> to vector<32x128xf32>
    %17 = vector.broadcast %12 : vector<1x128xf32> to vector<32x128xf32>
    %18 = arith.mulf %16, %17 : vector<32x128xf32>
    %19 = arith.addf %15, %18 : vector<32x128xf32>
    %20 = vector.broadcast %2 : vector<32x1xf32> to vector<32x128xf32>
    %21 = arith.addf %19, %20 : vector<32x128xf32>
    %22 = math.tanh %21 : vector<32x128xf32>
    %cst = arith.constant dense<0.000000e+00> : vector<1x128xf32>
    %23 = tpu.matmul %3, %22, %cst {dimension_numbers = #tpu.dot_dimension_numbers<[1], [0], [0], [1], [0, 0, 1, 1], [], []>} : vector<1x32xf32>, vector<32x128xf32>, vector<1x128xf32> -> vector<1x128xf32>
    %24 = math.exp %23 : vector<1x128xf32>
    %25 = arith.mulf %6, %24 : vector<1x128xf32>
    %c0_9 = arith.constant 0 : index
    %26 = arith.index_cast %8 : i32 to index
    %27 = vector.load %arg5[%c0_9, %26] : memref<1x128xf32, #tpu.memory_space<vmem>>, vector<1x128xf32>
    tpu.vector_store %arg5[%c0_9, %26], %25 {strides = array<i32>} : memref<1x128xf32, #tpu.memory_space<vmem>>, vector<1x128xf32>,
    %c1_i32 = arith.constant 1 : i32
    return
  }
  func.func @transform_0(%arg0: i32) -> (i32, i32) {
    %c0_i32 = arith.constant 0 : i32
    %c0_i32_0 = arith.constant 0 : i32
    return %c0_i32, %arg0 : i32, i32
  }
  func.func @transform_1(%arg0: i32) -> (i32, i32) {
    %c0_i32 = arith.constant 0 : i32
    %c0_i32_0 = arith.constant 0 : i32
    %c0_i32_1 = arith.constant 0 : i32
    return %c0_i32, %c0_i32_0 : i32, i32
  }
  func.func @transform_2(%arg0: i32) -> (i32, i32) {
    %c0_i32 = arith.constant 0 : i32
    %c0_i32_0 = arith.constant 0 : i32
    %c0_i32_1 = arith.constant 0 : i32
    return %c0_i32, %c0_i32_0 : i32, i32
  }
  func.func @transform_3(%arg0: i32) -> (i32, i32) {
    %c0_i32 = arith.constant 0 : i32
    %c0_i32_0 = arith.constant 0 : i32
    %c0_i32_1 = arith.constant 0 : i32
    return %c0_i32, %c0_i32_0 : i32, i32
  }
  func.func @transform_4(%arg0: i32) -> (i32, i32) {
    %c0_i32 = arith.constant 0 : i32
    %c0_i32_0 = arith.constant 0 : i32
    return %c0_i32, %arg0 : i32, i32
  }
}

</mosaic_0001>

<bundles_post_ra>
// kernel: net_forward.1
= control target key start
LH: loop header
LB: loop body
LE: loop exit
PB: predicated region body
PF: predicated region fallthrough
CT: control target
= control target key end

     0   :  { %v166_v0 = vmov 0   ;;  %v167_v4 = vmov 1   ;;  %v168_v6 = vmov 2   ;;  %vm107_vm0 = vcmask 261120   ;;  %s221_s1 = inlined_call_operand.vmem [shape: f32[32,3], index: 1, kind: input, shape index: {}]   ;;  %s222_s0 = inlined_call_operand.vmem [shape: f32[2,128], index: 0, kind: input, shape index: {}]   ;;  %s223_s3 = inlined_call_operand.<no memory space> [shape: f32[1,1], index: 3, kind: input, shape index: {}]   ;;  %s224_s2 = inlined_call_operand.vmem [shape: f32[1,32], index: 2, kind: input, shape index: {}]   ;;  %s225_s4 = inlined_call_operand.vmem [shape: f32[1,128], index: 4, kind: output, shape index: {}]  }
   0x1   :  { %145 = vset.pattern.permute.xlu1 %v166_v0  ;;  %143 = vset.pattern.permute.xlu0 %v166_v0  ;;  %v22_v1 = vld [vmem:[%s221_s1 + $0x18] sm:$0xff]  ;;  %v21_v2 = vld [vmem:[%s221_s1 + $0x10] sm:$0xff]  ;;  %v20_v3 = vld [vmem:[%s221_s1 + $0x8] sm:$0xff]  ;;  %v9_v13 = vstv %s223_s3 }
   0x2   :  { %50 = vperm.xlu0 %143, %v22_v1   ;;  %45 = vperm.xlu1 %145, %v21_v2   ;;  %v19_v5 = vld [vmem:[%s221_s1] sm:$0xff]  ;;  %10 = vst [vmem:[#allocation2] sm:$0x1] %v9_v13 }
   0x3   :  { %147 = vset.pattern.permute.xlu2 %v166_v0  ;;  %v155_v14 = vld [vmem:[%s222_s0 + $0x1] ss:$0 sm:$0xff]  ;;  %v154_v15 = vld [vmem:[%s222_s0] ss:$0 sm:$0xff] }
   0x4   :  { %40 = vperm.xlu2 %147, %v20_v3   ;;  %v23_v42 = vld [vmem:[%s224_s2] sm:$0x1] }
   0x9   :  { %v24_v21 = vld [vmem:[#allocation2] sm:$0x1] }
   0xa   :  { %144 = vset.pattern.permute.xlu0 %v167_v4  ;;  %146 = vset.pattern.permute.xlu1 %v167_v4 }
   0xb   :  { %71 = vperm.xlu0 %144, %v22_v1   ;;  %67 = vperm.xlu1 %146, %v21_v2  }
   0xc   :  { %148 = vset.pattern.permute.xlu2 %v167_v4 }
   0xd   :  { %63 = vperm.xlu2 %148, %v20_v3  }
  0x13   :  { %149 = vset.pattern.permute.xlu1 %v168_v6  ;;  %59 = vperm.xlu0 %144, %v19_v5  }
  0x14   :  { %96 = vperm.xlu1 %149, %v22_v1  }
  0x15   :  { %150 = vset.pattern.permute.xlu2 %v166_v0 }
  0x16   :  { %35 = vperm.xlu2 %150, %v19_v5  }
  0x1b   :  { %152 = vset.pattern.permute.xlu0 %v168_v6 }
  0x1c   :  { %92 = vperm.xlu1 %149, %v21_v2   ;;  %84 = vperm.xlu0 %152, %v19_v5  }
  0x1e   :  { %151 = vset.pattern.permute.xlu2 %v168_v6 }
  0x1f   :  { %88 = vperm.xlu2 %151, %v20_v3  }
  0x24   :  { %153 = vset.pattern.permute.xlu1 %v166_v0 }
  0x25   :  { %27 = vperm.xlu1 %153, %v24_v21  }
  0x5e   :  { %v41_v7 = vpop.permute.xlu2 %40 }
  0x5f   :  { %v55_v23 = vmul.f32 %v154_v15, %v41_v7 }
  0x67   :  { %v64_v10 = vpop.permute.xlu2 %63 }
  0x68   :  { %v76_v24 = vmul.f32 %v155_v14, %v64_v10 }
  0x6a   :  { %v80_v29 = vadd.f32 %v76_v24, %v55_v23 }
  0x70   :  { %v36_v17 = vpop.permute.xlu2 %35 }
  0x71   :  { %v54_v27 = vmul.f32 %v154_v15, %v36_v17 }
  0x74   :  { %v46_v8 = vpop.permute.xlu1 %45  ;;  %v51_v9 = vpop.permute.xlu0 %50 }
  0x75   :  { %v57_v18 = vmul.f32 %v154_v15, %v51_v9  ;;  %v56_v28 = vmul.f32 %v154_v15, %v46_v8 }
  0x79   :  { %v89_v31 = vpop.permute.xlu2 %88 }
  0x7a   :  { %v100_v36 = vadd.f32 %v89_v31, %v80_v29 }
  0x7d   :  { %v72_v11 = vpop.permute.xlu0 %71  ;;  %v68_v12 = vpop.permute.xlu1 %67 }
  0x7e   :  { %v78_v16 = vmul.f32 %v155_v14, %v72_v11  ;;  %v77_v26 = vmul.f32 %v155_v14, %v68_v12 }
  0x80   :  { %v82_v20 = vadd.f32 %v78_v16, %v57_v18  ;;  %v81_v32 = vadd.f32 %v77_v26, %v56_v28 }
  0x85   :  { %v60_v19 = vpop.permute.xlu0 %59 }
  0x86   :  { %v97_v22 = vpop.permute.xlu1 %96  ;;  %v75_v30 = vmul.f32 %v155_v14, %v60_v19 }
  0x87   :  { %v102_v25 = vadd.f32 %v97_v22, %v82_v20 }
  0x88   :  { %v79_v38 = vadd.f32 %v75_v30, %v54_v27 }
  0x89   :  { %156 = vtanh.f32 %v102_v25 }
  0x8e   :  { %v93_v33 = vpop.permute.xlu1 %92  ;;  %v85_v34 = vpop.permute.xlu0 %84 }
  0x8f   :  { %v157_v35 = vpop.eup %156  ;;  %v101_v37 = vadd.f32 %v93_v33, %v81_v32  ;;  %v99_v39 = vadd.f32 %v85_v34, %v79_v38 }
  0x90   :  { %123 = vmatpush.msra.mxu0 %v157_v35 }
  0x91   :  { %158 = vtanh.f32 %v101_v37 }
  0x92   :  { %160 = vtanh.f32 %v100_v36 }
  0x93   :  { %162 = vtanh.f32 %v99_v39 }
  0x97   :  { %v159_v40 = vpop.eup %158  ;;  %v28_v46 = vpop.permute.xlu1 %27 }
  0x98   :  { %124 = vmatpush.msra.mxu0 %v159_v40  ;;  %v161_v41 = vpop.eup %160  ;;  %v30_v47 = vperm.slane %v28_v46, 0 }
  0x99   :  { %v163_v43 = vpop.eup %162 }
  0x9a   :  { %125 = vmatpush.msra.mxu0 %v161_v41 }
  0x9c   :  { %126 = vmatpush.msra.mxu0 %v163_v43 }
  0x9d   :  { %139 = vmatmul.msk.f32.vlgmr.msra.gmra.mxu0 %vm107_vm0, %v23_v42 }
 0x11a   :  { %v128_v44 = vpop.f32.mrf.mxu0 }
 0x11b   :  { %v131_v45 = vmul.f32 1.442695, %v128_v44 }
 0x11d   :  { %164 = vpow2.f32 %v131_v45 }
 0x123   :  { %v165_v48 = vpop.eup %164 }
 0x124   :  { %v133_v49 = vmul.f32 %v165_v48, %v30_v47 }
 0x126   :  { %134 = vst [vmem:[%s225_s4] sm:$0x1] %v133_v49 }

</bundles_post_ra>
